<compile_context>
chip_gen: v7x
topology: tpu7x:2x2x1
jax: 0.10.0
libtpu: 0.0.40
codegen_flags: <defaults>
</compile_context>

<pallas_src>
import math

import jax
import jax.numpy as jnp
from jax.experimental import pallas as pl
from jax.experimental.pallas import tpu as pltpu

# ---------------- config (small shapes consistent with the module) ----------------
B, S = 2, 8            # leading dims of x for the demo
D_MODEL = 32           # d_model
D_HIDDEN = 128         # fixed by the module: nn.Linear(d_model, 128)
D_PIV = 32             # d_piv

MAX_BLOCK_ROWS = 4096  # original rows per grid step (feedback: 2048-4096)
SPLIT_ROWS = 2048      # above this, force >= 2 grid steps so v7x's 2nd TensorCore gets work


def _round_up(x, m):
    return (x + m - 1) // m * m


def _erf_poly(x):
    # Abramowitz & Stegun 7.1.26, |error| <= 1.5e-7 over all x.
    a1, a2, a3, a4, a5 = 0.254829592, -0.284496736, 1.421413741, -1.453152027, 1.061405429
    p = 0.3275911
    ax = jnp.abs(x)
    d = 1.0 + p * ax
    r = pl.reciprocal(d, approx=True)   # EUP vrcp: separate VLIW slot, essentially free
    t = r * (2.0 - d * r)               # one Newton step -> ~f32-accurate 1/d
    poly = ((((a5 * t + a4) * t + a3) * t + a2) * t + a1) * t
    y = 1.0 - poly * jnp.exp(-(ax * ax))
    return jnp.where(x < 0.0, -y, y)


def _gelu_exact(x):
    # PyTorch F.gelu default ("exact" erf-based GELU).
    return 0.5 * x * (1.0 + _erf_poly(x * (1.0 / math.sqrt(2.0))))


# ---------------- fused MLP kernel (shape-agnostic: works folded or plain) ----------------
def srfe_kernel(x_ref, w1_ref, b1_ref, w2_ref, b2_ref, o_ref):
    x = x_ref[...].astype(jnp.float32)                                                  # (rows, in_w)
    h = jnp.dot(x, w1_ref[...], preferred_element_type=jnp.float32) + b1_ref[...]       # (rows, mid_w)
    h = _gelu_exact(h)
    out = jnp.dot(h, w2_ref[...], preferred_element_type=jnp.float32) + b2_ref[...]     # (rows, out_w)
    o_ref[...] = out.astype(o_ref.dtype)


def performance_srfe(x, params):
    """x: (..., d_model) -> (..., d_piv); single fused Pallas call."""
    w1_t, b1, w2_t, b2 = params["w1_t"], params["b1"], params["w2_t"], params["b2"]
    d_model, d_hidden = w1_t.shape
    d_piv = w2_t.shape[1]

    lead = x.shape[:-1]
    n = math.prod(lead) if lead else 1
    x2 = x.reshape(n, d_model)            # native dtype: no host-side cast / extra HBM copy

    # ---- lane-dense row folding: pack `fold` consecutive rows into the lane axis ----
    fold = 128 // d_piv if (d_piv < 128 and 128 % d_piv == 0) else 1
    if fold > 1 and n % fold != 0:
        fold = 1                          # ragged row count: fall back to the plain layout
    if fold > 1:
        nf = n // fold
        xf = x2.reshape(nf, fold * d_model)          # free metadata reshape (row-major contiguous)
        eye = jnp.eye(fold, dtype=w1_t.dtype)
        # Block-diagonal weights: a single lane-dense matmul per layer, same MXU push count.
        # (One-time prep; in a real model these would be precomputed alongside the params.)
        w1 = jnp.kron(eye, w1_t)                     # (fold*d_model, fold*d_hidden)
        w2 = jnp.kron(eye, w2_t)                     # (fold*d_hidden, fold*d_piv)
        bb1 = jnp.tile(b1, (1, fold))                # (1, fold*d_hidden)
        bb2 = jnp.tile(b2, (1, fold))                # (1, fold*d_piv)
    else:
        nf = n
        xf, w1, bb1, w2, bb2 = x2, w1_t, b1, w2_t, b2

    in_w = fold * d_model
    mid_w = fold * d_hidden
    out_w = fold * d_piv

    # ---- row-block size: big blocks amortize per-step cost; >=2 blocks lets v7x shard across TCs ----
    max_block = max(8, MAX_BLOCK_ROWS // fold)       # in folded rows
    split = max(8, SPLIT_ROWS // fold)
    if nf <= split:
        block = nf                                   # single block == full extent (always legal)
    else:
        block = min(max_block, _round_up(pl.cdiv(nf, 2), 8))
    grid = (pl.cdiv(nf, block),)                     # boundary block handled by Pallas (no jnp.pad)

    out = pl.pallas_call(
        srfe_kernel,
        out_shape=jax.ShapeDtypeStruct((nf, out_w), jnp.float32),
        grid=grid,
        in_specs=[
            pl.BlockSpec((block, in_w), lambda i: (i, 0)),
            # Constant index_maps: Pallas skips re-copying blocks whose index is unchanged,
            # so the weights/biases are DMA'd once, not per grid step.
            pl.BlockSpec((in_w, mid_w), lambda i: (0, 0)),
            pl.BlockSpec((1, mid_w), lambda i: (0, 0)),
            pl.BlockSpec((mid_w, out_w), lambda i: (0, 0)),
            pl.BlockSpec((1, out_w), lambda i: (0, 0)),
        ],
        out_specs=pl.BlockSpec((block, out_w), lambda i: (i, 0)),
        compiler_params=pltpu.CompilerParams(
            dimension_semantics=("parallel",),
            vmem_limit_bytes=32 * 1024 * 1024,
        ),
    )(xf, w1, bb1, w2, bb2)

    return out.reshape(*lead, d_piv)


# -------- deterministic parameter init (PyTorch Linear layout, pre-transposed) --------
def init_params(key, d_model, d_piv):
    k1, k2, k3, k4 = jax.random.split(key, 4)
    s1 = 1.0 / math.sqrt(d_model)
    s2 = 1.0 / math.sqrt(D_HIDDEN)
    # nn.Linear stores weight as (out, in); pre-transpose so the kernel does row-major x @ W^T.
    w1 = jax.random.uniform(k1, (D_HIDDEN, d_model), jnp.float32, -s1, s1)
    b1 = jax.random.uniform(k2, (D_HIDDEN,), jnp.float32, -s1, s1)
    w2 = jax.random.uniform(k3, (d_piv, D_HIDDEN), jnp.float32, -s2, s2)
    b2 = jax.random.uniform(k4, (d_piv,), jnp.float32, -s2, s2)
    return {
        "w1_t": w1.T,                    # (d_model, 128)
        "b1": b1.reshape(1, D_HIDDEN),   # (1, 128)
        "w2_t": w2.T,                    # (128, d_piv)
        "b2": b2.reshape(1, d_piv),      # (1, d_piv)
    }


# ---------------- pure-JAX reference (sanity check) ----------------
def reference_srfe(x, params):
    h = x.astype(jnp.float32) @ params["w1_t"] + params["b1"]
    h = jax.nn.gelu(h, approximate=False)     # exact erf GELU (matches F.gelu default)
    return h @ params["w2_t"] + params["b2"]


if __name__ == "__main__":
    key = jax.random.PRNGKey(0)
    kx, kp, kx2, kx3 = jax.random.split(key, 4)

    params = init_params(kp, D_MODEL, D_PIV)

    # Primary small case (batch=2, seq=8, d_model=32) -> single lane-folded block.
    x = jax.random.normal(kx, (B, S, D_MODEL), jnp.float32)
    y = jax.block_until_ready(performance_srfe(x, params))
    assert y.shape == (B, S, D_PIV)
    assert bool(jnp.all(jnp.isfinite(y)))
    ref = reference_srfe(x.reshape(-1, D_MODEL), params).reshape(B, S, D_PIV)
    err = float(jnp.max(jnp.abs(y - ref)))
    assert err < 1e-4, f"small-case mismatch vs reference: {err}"

    # Multi-block path: 2080 rows -> lane-folded, grid of 2, boundary block masked (no wrapper pad).
    x_big = jax.random.normal(kx2, (8, 260, D_MODEL), jnp.float32)
    y_big = jax.block_until_ready(performance_srfe(x_big, params))
    ref_big = reference_srfe(x_big.reshape(-1, D_MODEL), params).reshape(8, 260, D_PIV)
    err_big = float(jnp.max(jnp.abs(y_big - ref_big)))
    assert err_big < 1e-4, f"multi-block mismatch vs reference: {err_big}"

    # Fold-disabled fallback (row count not a multiple of 128 // d_piv).
    x_odd = jax.random.normal(kx3, (5, 7, D_MODEL), jnp.float32)
    y_odd = jax.block_until_ready(performance_srfe(x_odd, params))
    ref_odd = reference_srfe(x_odd.reshape(-1, D_MODEL), params).reshape(5, 7, D_PIV)
    err_odd = float(jnp.max(jnp.abs(y_odd - ref_odd)))
    assert err_odd < 1e-4, f"fallback mismatch vs reference: {err_odd}"

    print("KERNEL_OK")
</pallas_src>

<mosaic_0001>
module attributes {stable_mosaic.version = 11 : i64} {
  func.func @srfe_kernel(%arg0: i32, %arg1: memref<4x128xf32, #tpu.memory_space<vmem>>, %arg2: memref<128x512xf32, #tpu.memory_space<vmem>>, %arg3: memref<1x512xf32, #tpu.memory_space<vmem>>, %arg4: memref<512x128xf32, #tpu.memory_space<vmem>>, %arg5: memref<1x128xf32, #tpu.memory_space<vmem>>, %arg6: memref<4x128xf32, #tpu.memory_space<vmem>>) attributes {dimension_semantics = [#tpu.dimension_semantics<parallel>], iteration_bounds = array<i64: 1>, scalar_prefetch = 0 : i64, scratch_operands = 0 : i64, tpu.core_type = #tpu.core_type<tc>, window_params = [{transform_indices = @transform_0, window_bounds = array<i64: 4, 128>}, {pipeline_mode = #tpu.pipeline_mode<synchronous>, transform_indices = @transform_1, window_bounds = array<i64: 128, 512>}, {pipeline_mode = #tpu.pipeline_mode<synchronous>, transform_indices = @transform_2, window_bounds = array<i64: 1, 512>}, {pipeline_mode = #tpu.pipeline_mode<synchronous>, transform_indices = @transform_3, window_bounds = array<i64: 512, 128>}, {pipeline_mode = #tpu.pipeline_mode<synchronous>, transform_indices = @transform_4, window_bounds = array<i64: 1, 128>}, {transform_indices = @transform_5, window_bounds = array<i64: 4, 128>}]} {
    %c0 = arith.constant 0 : index
    %c0_0 = arith.constant 0 : index
    %0 = vector.load %arg1[%c0, %c0_0] : memref<4x128xf32, #tpu.memory_space<vmem>>, vector<4x128xf32>
    %c0_1 = arith.constant 0 : index
    %c0_2 = arith.constant 0 : index
    %1 = vector.load %arg2[%c0_1, %c0_2] : memref<128x512xf32, #tpu.memory_space<vmem>>, vector<128x512xf32>
    %cst = arith.constant dense<0.000000e+00> : vector<4x512xf32>
    %2 = tpu.matmul %0, %1, %cst {dimension_numbers = #tpu.dot_dimension_numbers<[1], [0], [0], [1], [0, 0, 1, 1], [], []>} : vector<4x128xf32>, vector<128x512xf32>, vector<4x512xf32> -> vector<4x512xf32>
    %c0_3 = arith.constant 0 : index
    %c0_4 = arith.constant 0 : index
    %3 = vector.load %arg3[%c0_3, %c0_4] : memref<1x512xf32, #tpu.memory_space<vmem>>, vector<1x512xf32>
    %4 = vector.broadcast %3 : vector<1x512xf32> to vector<4x512xf32>
    %5 = arith.addf %2, %4 : vector<4x512xf32>
    %cst_5 = arith.constant 5.000000e-01 : f32
    %6 = vector.broadcast %cst_5 : f32 to vector<4x512xf32>
    %7 = arith.mulf %6, %5 : vector<4x512xf32>
    %cst_6 = arith.constant 0.707106769 : f32
    %8 = vector.broadcast %cst_6 : f32 to vector<4x512xf32>
    %9 = arith.mulf %5, %8 : vector<4x512xf32>
    %10 = math.absf %9 : vector<4x512xf32>
    %cst_7 = arith.constant 0.327591091 : f32
    %11 = vector.broadcast %cst_7 : f32 to vector<4x512xf32>
    %12 = arith.mulf %11, %10 : vector<4x512xf32>
    %cst_8 = arith.constant 1.000000e+00 : f32
    %13 = vector.broadcast %cst_8 : f32 to vector<4x512xf32>
    %14 = arith.addf %13, %12 : vector<4x512xf32>
    %15 = tpu.reciprocal %14 {approx = true} : vector<4x512xf32> -> vector<4x512xf32>
    %16 = arith.mulf %14, %15 : vector<4x512xf32>
    %cst_9 = arith.constant 2.000000e+00 : f32
    %17 = vector.broadcast %cst_9 : f32 to vector<4x512xf32>
    %18 = arith.subf %17, %16 : vector<4x512xf32>
    %19 = arith.mulf %15, %18 : vector<4x512xf32>
    %cst_10 = arith.constant 1.06140542 : f32
    %20 = vector.broadcast %cst_10 : f32 to vector<4x512xf32>
    %21 = arith.mulf %20, %19 : vector<4x512xf32>
    %cst_11 = arith.constant -1.45315206 : f32
    %22 = vector.broadcast %cst_11 : f32 to vector<4x512xf32>
    %23 = arith.addf %21, %22 : vector<4x512xf32>
    %24 = arith.mulf %23, %19 : vector<4x512xf32>
    %cst_12 = arith.constant 1.42141378 : f32
    %25 = vector.broadcast %cst_12 : f32 to vector<4x512xf32>
    %26 = arith.addf %24, %25 : vector<4x512xf32>
    %27 = arith.mulf %26, %19 : vector<4x512xf32>
    %cst_13 = arith.constant -0.284496725 : f32
    %28 = vector.broadcast %cst_13 : f32 to vector<4x512xf32>
    %29 = arith.addf %27, %28 : vector<4x512xf32>
    %30 = arith.mulf %29, %19 : vector<4x512xf32>
    %cst_14 = arith.constant 0.254829586 : f32
    %31 = vector.broadcast %cst_14 : f32 to vector<4x512xf32>
    %32 = arith.addf %30, %31 : vector<4x512xf32>
    %33 = arith.mulf %32, %19 : vector<4x512xf32>
    %34 = arith.mulf %10, %10 : vector<4x512xf32>
    %cst_15 = arith.constant 0.000000e+00 : f32
    %35 = vector.broadcast %cst_15 : f32 to vector<4x512xf32>
    %36 = arith.subf %35, %34 : vector<4x512xf32>
    %37 = math.exp %36 : vector<4x512xf32>
    %38 = arith.mulf %33, %37 : vector<4x512xf32>
    %cst_16 = arith.constant 1.000000e+00 : f32
    %39 = vector.broadcast %cst_16 : f32 to vector<4x512xf32>
    %40 = arith.subf %39, %38 : vector<4x512xf32>
    %cst_17 = arith.constant 0.000000e+00 : f32
    %41 = vector.broadcast %cst_17 : f32 to vector<4x512xf32>
    %42 = arith.cmpf olt, %9, %41 : vector<4x512xf32>
    %cst_18 = arith.constant 0.000000e+00 : f32
    %43 = vector.broadcast %cst_18 : f32 to vector<4x512xf32>
    %44 = arith.subf %43, %40 : vector<4x512xf32>
    %45 = arith.select %42, %44, %40 : vector<4x512xi1>, vector<4x512xf32>
    %cst_19 = arith.constant 1.000000e+00 : f32
    %46 = vector.broadcast %cst_19 : f32 to vector<4x512xf32>
    %47 = arith.addf %46, %45 : vector<4x512xf32>
    %48 = arith.mulf %7, %47 : vector<4x512xf32>
    %c0_20 = arith.constant 0 : index
    %c0_21 = arith.constant 0 : index
    %49 = vector.load %arg4[%c0_20, %c0_21] : memref<512x128xf32, #tpu.memory_space<vmem>>, vector<512x128xf32>
    %cst_22 = arith.constant dense<0.000000e+00> : vector<4x128xf32>
    %50 = tpu.matmul %48, %49, %cst_22 {dimension_numbers = #tpu.dot_dimension_numbers<[1], [0], [0], [1], [0, 0, 1, 1], [], []>} : vector<4x512xf32>, vector<512x128xf32>, vector<4x128xf32> -> vector<4x128xf32>
    %c0_23 = arith.constant 0 : index
    %c0_24 = arith.constant 0 : index
    %51 = vector.load %arg5[%c0_23, %c0_24] : memref<1x128xf32, #tpu.memory_space<vmem>>, vector<1x128xf32>
    %52 = vector.broadcast %51 : vector<1x128xf32> to vector<4x128xf32>
    %53 = arith.addf %50, %52 : vector<4x128xf32>
    %c0_25 = arith.constant 0 : index
    %c0_26 = arith.constant 0 : index
    %54 = vector.load %arg6[%c0_25, %c0_26] : memref<4x128xf32, #tpu.memory_space<vmem>>, vector<4x128xf32>
    tpu.vector_store %arg6[%c0_25, %c0_26], %53 {strides = array<i32>} : memref<4x128xf32, #tpu.memory_space<vmem>>, vector<4x128xf32>,
    return
  }
  func.func @transform_0(%arg0: i32) -> (i32, i32) {
    %c0_i32 = arith.constant 0 : i32
    %c0_i32_0 = arith.constant 0 : i32
    return %arg0, %c0_i32 : i32, i32
  }
  func.func @transform_1(%arg0: i32) -> (i32, i32) {
    %c0_i32 = arith.constant 0 : i32
    %c0_i32_0 = arith.constant 0 : i32
    %c0_i32_1 = arith.constant 0 : i32
    return %c0_i32, %c0_i32_0 : i32, i32
  }
  func.func @transform_2(%arg0: i32) -> (i32, i32) {
    %c0_i32 = arith.constant 0 : i32
    %c0_i32_0 = arith.constant 0 : i32
    %c0_i32_1 = arith.constant 0 : i32
    return %c0_i32, %c0_i32_0 : i32, i32
  }
  func.func @transform_3(%arg0: i32) -> (i32, i32) {
    %c0_i32 = arith.constant 0 : i32
    %c0_i32_0 = arith.constant 0 : i32
    %c0_i32_1 = arith.constant 0 : i32
    return %c0_i32, %c0_i32_0 : i32, i32
  }
  func.func @transform_4(%arg0: i32) -> (i32, i32) {
    %c0_i32 = arith.constant 0 : i32
    %c0_i32_0 = arith.constant 0 : i32
    %c0_i32_1 = arith.constant 0 : i32
    return %c0_i32, %c0_i32_0 : i32, i32
  }
  func.func @transform_5(%arg0: i32) -> (i32, i32) {
    %c0_i32 = arith.constant 0 : i32
    %c0_i32_0 = arith.constant 0 : i32
    return %arg0, %c0_i32 : i32, i32
  }
}

</mosaic_0001>

<bundles_post_ra>
// kernel: tpu_custom_call.1
= control target key start
LH: loop header
LB: loop body
LE: loop exit
PB: predicated region body
PF: predicated region fallthrough
CT: control target
= control target key end

     0   :  { %10 = vsyncpa [#allocation3], 0  ;;  %s1076_s0 = inlined_call_operand.hbm [shape: f32[4,128], index: 0, kind: input, shape index: {}]   ;;  %s1077_s1 = inlined_call_operand.hbm [shape: f32[128,512], index: 1, kind: input, shape index: {}]   ;;  %s1078_s2 = inlined_call_operand.vmem [shape: f32[1,512], index: 2, kind: input, shape index: {}]   ;;  %s1079_s3 = inlined_call_operand.hbm [shape: f32[512,128], index: 3, kind: input, shape index: {}]   ;;  %s1080_s4 = inlined_call_operand.vmem [shape: f32[1,128], index: 4, kind: input, shape index: {}]   ;;  %s1081_s5 = inlined_call_operand.hbm [shape: f32[4,128], index: 5, kind: output, shape index: {}]  }
   0x1   :  { %11 = vsyncpa [#allocation6], 0 }
   0x2   :  { %12 = vsyncpa [#allocation4], 0  ;;  %s951_s18 = smov [#allocation5]   ;;  %s857_s22 = scalar_lea.hbm %s1077_s1, 8192 }
   0x3   :  { %s28_s19 = sshll.u32 %s951_s18, 4  ;;  %p858_p0 = scmp.ne.s32.totalorder %s1077_s1, %s857_s22  ;;  %s29_s19 = int_to_ptr.vmem [resolvable:$true] %s28_s19 }
   0x4   :  { %p861_p1 = scmp.lt.u32.totalorder %s857_s22, %s1077_s1 }
   0x6   :  { %p863_p2 = pnand %p861_p1, %p858_p0 }
   0x8   :  { %866 = shalt.err (!%p863_p2)
}
   0x9   :  { %s867_s27 = scalar_lea.vmem %s29_s19, 8192  ;;  %p872_p4 = scmp.lt.s32.totalorder %s29_s19, %s29_s19 }
   0xa   :  { %p868_p3 = scmp.ne.s32.totalorder %s29_s19, %s867_s27  ;;  %p873_p5 = scmp.lt.s32.totalorder %s867_s27, %s867_s27 }
   0xc   :  { %p874_p6 = por %p873_p5, %p872_p4 }
   0xe   :  { %p875_p7 = pnand %p874_p6, %p868_p3 }
  0x10   :  { %878 = shalt.err (!%p875_p7)
}
  0x11   :  { %s952_s28 = smov 512   ;;  %s953_s29 = smov 32  }
  0x12   :  { %34 = dma.hbm_to_vmem [thread:$0]  %s1077_s1, 8192, %s29_s19, [#allocation6], %s952_s28, %s952_s28, %s953_s29  }
  0x13   :  { %s954_s7 = smov [#allocation2]   ;;  %s955_s9 = smov [#allocation7]  }
  0x14   :  { %s19_s8 = sshll.u32 %s954_s7, 4  ;;  %s42_s10 = sshll.u32 %s955_s9, 4  ;;  %s20_s8 = int_to_ptr.vmem [resolvable:$true] %s19_s8  ;;  %s43_s10 = int_to_ptr.vmem [resolvable:$true] %s42_s10 }
  0x15   :  { %s879_s13 = scalar_lea.hbm %s1076_s0, 64 }
  0x16   :  { %p880_p8 = scmp.ne.s32.totalorder %s1076_s0, %s879_s13  ;;  %p883_p9 = scmp.lt.u32.totalorder %s879_s13, %s1076_s0 }
  0x18   :  { %p885_p10 = pnand %p883_p9, %p880_p8 }
  0x1a   :  { %888 = shalt.err (!%p885_p10)
}
  0x1b   :  { %s889_s1 = scalar_lea.vmem %s20_s8, 64  ;;  %p894_p12 = scmp.lt.s32.totalorder %s20_s8, %s20_s8 }
  0x1c   :  { %p890_p11 = scmp.ne.s32.totalorder %s20_s8, %s889_s1  ;;  %p895_p13 = scmp.lt.s32.totalorder %s889_s1, %s889_s1 }
  0x1e   :  { %p896_p0 = por %p895_p13, %p894_p12 }
  0x20   :  { %p897_p1 = pnand %p896_p0, %p890_p11 }
  0x22   :  { %900 = shalt.err (!%p897_p1)
}
  0x23   :  { %22 = dma.hbm_to_vmem [thread:$0]  %s1076_s0, 64, %s20_s8, [#allocation3]  }
  0x24   :  { %s901_s22 = scalar_lea.hbm %s1079_s3, 8192 }
  0x25   :  { %p902_p2 = scmp.ne.s32.totalorder %s1079_s3, %s901_s22  ;;  %p905_p3 = scmp.lt.u32.totalorder %s901_s22, %s1079_s3 }
  0x27   :  { %p907_p4 = pnand %p905_p3, %p902_p2 }
  0x29   :  { %910 = shalt.err (!%p907_p4)
}
  0x2a   :  { %s911_s27 = scalar_lea.vmem %s43_s10, 8192  ;;  %p916_p6 = scmp.lt.s32.totalorder %s43_s10, %s43_s10 }
  0x2b   :  { %p912_p5 = scmp.ne.s32.totalorder %s43_s10, %s911_s27  ;;  %p917_p7 = scmp.lt.s32.totalorder %s911_s27, %s911_s27 }
  0x2d   :  { %p918_p8 = por %p917_p7, %p916_p6 }
  0x2f   :  { %p919_p9 = pnand %p918_p8, %p912_p5 }
  0x31   :  { %922 = shalt.err (!%p919_p9)
}
  0x32   :  { %s956_s0 = smov 128   ;;  %s957_s28 = smov 8  }
  0x33   :  { %48 = dma.hbm_to_vmem [thread:$0]  %s1079_s3, 8192, %s43_s10, [#allocation6], %s956_s0, %s956_s0, %s957_s28  }
  0x34   :  { %945 = dma.done.wait [#allocation3], 64  }
  0x35   :  { %946 = vsyncadd [#allocation3], 4294967232 }
  0x36   :  { %947 = dma.done.wait [#allocation6], 16384  }
  0x37   :  { %948 = vsyncadd [#allocation6], 4294950912  ;;  %v958_v0 = vmov 0.0   ;;  %v62_v1 = vld [vmem:[#allocation5 + $0x8] sm:$0xff]  ;;  %v64_v3 = vld [vmem:[#allocation5 + $0x18] sm:$0xff]  ;;  %s959_s8 = smov [#allocation8]  }
  0x38   :  { %211 = vmatprep.mubr.f32.mxu0 %v958_v0  ;;  %282 = vmatprep.mubr.f32.mxu1 %v958_v0  ;;  %v66_v2 = vld [vmem:[#allocation5 + $0x28] sm:$0xff]  ;;  %v68_v5 = vld [vmem:[#allocation5 + $0x38] sm:$0xff]  ;;  %v61_v6 = vld [vmem:[#allocation5] sm:$0xff]  ;;  %s623_s9 = sshll.u32 %s959_s8, 4  ;;  %s624_s9 = int_to_ptr.vmem [resolvable:$true] %s623_s9 }
  0x39   :  { %v704_v4 = vpack.c.bf16 %v66_v2, %v62_v1  ;;  %v65_v7 = vld [vmem:[#allocation5 + $0x20] sm:$0xff]  ;;  %v736_v8 = vpack.c.bf16 %v68_v5, %v64_v3  ;;  %v63_v10 = vld [vmem:[#allocation5 + $0x10] sm:$0xff]  ;;  %v70_v12 = vld [vmem:[#allocation5 + $0x48] sm:$0xff]  ;;  %s923_s10 = scalar_lea.vmem %s624_s9, 64  ;;  %p928_p11 = scmp.lt.s32.totalorder %s624_s9, %s624_s9 }
  0x3a   :  { %v706_v9 = vpack.c.bf16 %v65_v7, %v61_v6  ;;  %v67_v11 = vld [vmem:[#allocation5 + $0x30] sm:$0xff]  ;;  %v74_v14 = vld [vmem:[#allocation5 + $0x68] sm:$0xff]  ;;  %v72_v15 = vld [vmem:[#allocation5 + $0x58] sm:$0xff]  ;;  %p924_p10 = scmp.ne.s32.totalorder %s624_s9, %s923_s10  ;;  %p929_p12 = scmp.lt.s32.totalorder %s923_s10, %s923_s10 }
  0x3b   :  { %705 = vmatprep.subr.bf16.mxu0 %v704_v4  ;;  %v738_v13 = vpack.c.bf16 %v67_v11, %v63_v10  ;;  %v76_v16 = vld [vmem:[#allocation5 + $0x78] sm:$0xff]  ;;  %737 = vmatprep.subr.bf16.mxu1 %v736_v8  ;;  %v708_v17 = vpack.c.bf16 %v74_v14, %v70_v12  ;;  %v69_v19 = vld [vmem:[#allocation5 + $0x40] sm:$0xff]  ;;  %v71_v21 = vld [vmem:[#allocation5 + $0x50] sm:$0xff] }
  0x3c   :  { %707 = vmatpush1.bf16.msra.mxu0 %v706_v9  ;;  %v740_v18 = vpack.c.bf16 %v76_v16, %v72_v15  ;;  %v73_v20 = vld [vmem:[#allocation5 + $0x60] sm:$0xff]  ;;  %v75_v23 = vld [vmem:[#allocation5 + $0x70] sm:$0xff]  ;;  %v78_v24 = vld [vmem:[#allocation5 + $0x88] sm:$0xff]  ;;  %p930_p13 = por %p929_p12, %p928_p11 }
  0x3d   :  { %739 = vmatpush1.bf16.msra.mxu1 %v738_v13  ;;  %v710_v22 = vpack.c.bf16 %v73_v20, %v69_v19  ;;  %v82_v25 = vld [vmem:[#allocation5 + $0xa8] sm:$0xff]  ;;  %709 = vmatprep.subr.bf16.mxu0 %v708_v17  ;;  %v742_v26 = vpack.c.bf16 %v75_v23, %v71_v21  ;;  %v80_v28 = vld [vmem:[#allocation5 + $0x98] sm:$0xff]  ;;  %v77_v30 = vld [vmem:[#allocation5 + $0x80] sm:$0xff] }
  0x3e   :  { %741 = vmatprep.subr.bf16.mxu1 %v740_v18  ;;  %v712_v27 = vpack.c.bf16 %v82_v25, %v78_v24  ;;  %v84_v29 = vld [vmem:[#allocation5 + $0xb8] sm:$0xff]  ;;  %v81_v32 = vld [vmem:[#allocation5 + $0xa0] sm:$0xff]  ;;  %v79_v33 = vld [vmem:[#allocation5 + $0x90] sm:$0xff]  ;;  %p931_p0 = pnand %p930_p13, %p924_p10 }
  0x3f   :  { %v744_v31 = vpack.c.bf16 %v84_v29, %v80_v28  ;;  %v83_v34 = vld [vmem:[#allocation5 + $0xb0] sm:$0xff]  ;;  %v714_v35 = vpack.c.bf16 %v81_v32, %v77_v30  ;;  %v86_v36 = vld [vmem:[#allocation5 + $0xc8] sm:$0xff]  ;;  %v88_v38 = vld [vmem:[#allocation5 + $0xd8] sm:$0xff] }
  0x40   :  { %711 = vmatpush1.bf16.msra.mxu0 %v710_v22  ;;  %v90_v37 = vld [vmem:[#allocation5 + $0xe8] sm:$0xff]  ;;  %v746_v39 = vpack.c.bf16 %v83_v34, %v79_v33  ;;  %v92_v41 = vld [vmem:[#allocation5 + $0xf8] sm:$0xff]  ;;  %v85_v42 = vld [vmem:[#allocation5 + $0xc0] sm:$0xff] }
  0x41   :  { %743 = vmatpush1.bf16.msra.mxu1 %v742_v26  ;;  %713 = vmatprep.subr.bf16.mxu0 %v712_v27  ;;  %v716_v40 = vpack.c.bf16 %v90_v37, %v86_v36  ;;  %v89_v43 = vld [vmem:[#allocation5 + $0xe0] sm:$0xff]  ;;  %v748_v44 = vpack.c.bf16 %v92_v41, %v88_v38  ;;  %v87_v45 = vld [vmem:[#allocation5 + $0xd0] sm:$0xff]  ;;  %v94_v47 = vld [vmem:[#allocation5 + $0x108] sm:$0xff] }
  0x42   :  { %745 = vmatprep.subr.bf16.mxu1 %v744_v31  ;;  %v91_v46 = vld [vmem:[#allocation5 + $0xf0] sm:$0xff]  ;;  %v98_v48 = vld [vmem:[#allocation5 + $0x128] sm:$0xff]  ;;  %v96_v49 = vld [vmem:[#allocation5 + $0x118] sm:$0xff]  ;;  %v718_v51 = vpack.c.bf16 %v89_v43, %v85_v42 }
  0x43   :  { %v100_v50 = vld [vmem:[#allocation5 + $0x138] sm:$0xff]  ;;  %v750_v52 = vpack.c.bf16 %v91_v46, %v87_v45  ;;  %v720_v53 = vpack.c.bf16 %v98_v48, %v94_v47  ;;  %v93_v54 = vld [vmem:[#allocation5 + $0x100] sm:$0xff]  ;;  %v95_v56 = vld [vmem:[#allocation5 + $0x110] sm:$0xff] }
  0x44   :  { %715 = vmatpush1.bf16.msra.mxu0 %v714_v35  ;;  %v97_v55 = vld [vmem:[#allocation5 + $0x120] sm:$0xff]  ;;  %v752_v57 = vpack.c.bf16 %v100_v50, %v96_v49  ;;  %v99_v58 = vld [vmem:[#allocation5 + $0x130] sm:$0xff]  ;;  %v102_v59 = vld [vmem:[#allocation5 + $0x148] sm:$0xff] }
  0x45   :  { %747 = vmatpush1.bf16.msra.mxu1 %v746_v39  ;;  %717 = vmatprep.subr.bf16.mxu0 %v716_v40  ;;  %v106_v60 = vld [vmem:[#allocation5 + $0x168] sm:$0xff]  ;;  %v104_v61 = vld [vmem:[#allocation5 + $0x158] sm:$0xff]  ;;  %v722_v63 = vpack.c.bf16 %v97_v55, %v93_v54  ;;  %v754_v0 = vpack.c.bf16 %v99_v58, %v95_v56  ;;  %v101_v2 = vld [vmem:[#allocation5 + $0x140] sm:$0xff] }
  0x46   :  { %749 = vmatprep.subr.bf16.mxu1 %v748_v44  ;;  %v108_v62 = vld [vmem:[#allocation5 + $0x178] sm:$0xff]  ;;  %v724_v1 = vpack.c.bf16 %v106_v60, %v102_v59  ;;  %v105_v3 = vld [vmem:[#allocation5 + $0x160] sm:$0xff]  ;;  %v103_v4 = vld [vmem:[#allocation5 + $0x150] sm:$0xff] }
  0x47   :  { %v756_v5 = vpack.c.bf16 %v108_v62, %v104_v61  ;;  %v107_v6 = vld [vmem:[#allocation5 + $0x170] sm:$0xff]  ;;  %v110_v7 = vld [vmem:[#allocation5 + $0x188] sm:$0xff]  ;;  %v112_v9 = vld [vmem:[#allocation5 + $0x198] sm:$0xff]  ;;  %v726_v11 = vpack.c.bf16 %v105_v3, %v101_v2 }
  0x48   :  { %719 = vmatpush1.bf16.msra.mxu0 %v718_v51  ;;  %v114_v8 = vld [vmem:[#allocation5 + $0x1a8] sm:$0xff]  ;;  %v116_v10 = vld [vmem:[#allocation5 + $0x1b8] sm:$0xff]  ;;  %v758_v12 = vpack.c.bf16 %v107_v6, %v103_v4  ;;  %v109_v14 = vld [vmem:[#allocation5 + $0x180] sm:$0xff] }
  0x49   :  { %751 = vmatpush1.bf16.msra.mxu1 %v750_v52  ;;  %721 = vmatprep.subr.bf16.mxu0 %v720_v53  ;;  %v728_v13 = vpack.c.bf16 %v114_v8, %v110_v7  ;;  %v113_v15 = vld [vmem:[#allocation5 + $0x1a0] sm:$0xff]  ;;  %v111_v16 = vld [vmem:[#allocation5 + $0x190] sm:$0xff]  ;;  %v760_v17 = vpack.c.bf16 %v116_v10, %v112_v9  ;;  %v118_v19 = vld [vmem:[#allocation5 + $0x1c8] sm:$0xff] }
  0x4a   :  { %753 = vmatprep.subr.bf16.mxu1 %v752_v57  ;;  %v115_v18 = vld [vmem:[#allocation5 + $0x1b0] sm:$0xff]  ;;  %v122_v20 = vld [vmem:[#allocation5 + $0x1e8] sm:$0xff]  ;;  %v120_v21 = vld [vmem:[#allocation5 + $0x1d8] sm:$0xff]  ;;  %v730_v23 = vpack.c.bf16 %v113_v15, %v109_v14 }
  0x4b   :  { %v124_v22 = vld [vmem:[#allocation5 + $0x1f8] sm:$0xff]  ;;  %v762_v24 = vpack.c.bf16 %v115_v18, %v111_v16  ;;  %v732_v25 = vpack.c.bf16 %v122_v20, %v118_v19  ;;  %v117_v26 = vld [vmem:[#allocation5 + $0x1c0] sm:$0xff]  ;;  %v119_v29 = vld [vmem:[#allocation5 + $0x1d0] sm:$0xff] }
  0x4c   :  { %723 = vmatpush1.bf16.msra.mxu0 %v722_v63  ;;  %v121_v27 = vld [vmem:[#allocation5 + $0x1e0] sm:$0xff]  ;;  %v764_v28 = vpack.c.bf16 %v124_v22, %v120_v21  ;;  %v123_v30 = vld [vmem:[#allocation5 + $0x1f0] sm:$0xff]  ;;  %v60_v33 = vld [vmem:[#allocation2] sm:$0xf] }
  0x4d   :  { %755 = vmatpush1.bf16.msra.mxu1 %v754_v0  ;;  %725 = vmatprep.subr.bf16.mxu0 %v724_v1  ;;  %v734_v31 = vpack.c.bf16 %v121_v27, %v117_v26  ;;  %v766_v32 = vpack.c.bf16 %v123_v30, %v119_v29  ;;  %v421_v34 = vld [vmem:[#allocation7 + $0x80] sm:$0xff]  ;;  %v422_v35 = vld [vmem:[#allocation7 + $0x88] sm:$0xff]  ;;  %v423_v46 = vld [vmem:[#allocation7 + $0x90] sm:$0xff] }
  0x4e   :  { %757 = vmatprep.subr.bf16.mxu1 %v756_v5  ;;  %v453_v36 = vld [vmem:[#allocation7 + $0x180] sm:$0xff]  ;;  %v768_v37 = vpack.c.bf16 %v422_v35, %v421_v34  ;;  %v454_v38 = vld [vmem:[#allocation7 + $0x188] sm:$0xff]  ;;  %v424_v47 = vld [vmem:[#allocation7 + $0x98] sm:$0xff] }
  0x4f   :  { %v405_v39 = vld [vmem:[#allocation7] sm:$0xff]  ;;  %v406_v40 = vld [vmem:[#allocation7 + $0x8] sm:$0xff]  ;;  %v800_v41 = vpack.c.bf16 %v454_v38, %v453_v36  ;;  %v455_v48 = vld [vmem:[#allocation7 + $0x190] sm:$0xff]  ;;  %v772_v49 = vpack.c.bf16 %v424_v47, %v423_v46 }
  0x50   :  { %727 = vmatpush1.bf16.msra.mxu0 %v726_v11  ;;  %v770_v42 = vpack.c.bf16 %v406_v40, %v405_v39  ;;  %v437_v43 = vld [vmem:[#allocation7 + $0x100] sm:$0xff]  ;;  %v438_v44 = vld [vmem:[#allocation7 + $0x108] sm:$0xff]  ;;  %v456_v50 = vld [vmem:[#allocation7 + $0x198] sm:$0xff] }
  0x51   :  { %759 = vmatpush1.bf16.msra.mxu1 %v758_v12  ;;  %729 = vmatprep.subr.bf16.mxu0 %v728_v13  ;;  %v802_v45 = vpack.c.bf16 %v438_v44, %v437_v43  ;;  %v407_v51 = vld [vmem:[#allocation7 + $0x10] sm:$0xff]  ;;  %v408_v52 = vld [vmem:[#allocation7 + $0x18] sm:$0xff]  ;;  %v804_v53 = vpack.c.bf16 %v456_v50, %v455_v48  ;;  %v425_v58 = vld [vmem:[#allocation7 + $0xa0] sm:$0xff] }
  0x52   :  { %761 = vmatprep.subr.bf16.mxu1 %v760_v17  ;;  %v774_v54 = vpack.c.bf16 %v408_v52, %v407_v51  ;;  %v439_v55 = vld [vmem:[#allocation7 + $0x110] sm:$0xff]  ;;  %v440_v56 = vld [vmem:[#allocation7 + $0x118] sm:$0xff]  ;;  %v426_v59 = vld [vmem:[#allocation7 + $0xa8] sm:$0xff] }
  0x53   :  { %v806_v57 = vpack.c.bf16 %v440_v56, %v439_v55  ;;  %v457_v60 = vld [vmem:[#allocation7 + $0x1a0] sm:$0xff]  ;;  %v776_v61 = vpack.c.bf16 %v426_v59, %v425_v58  ;;  %v458_v62 = vld [vmem:[#allocation7 + $0x1a8] sm:$0xff]  ;;  %v427_v6 = vld [vmem:[#allocation7 + $0xb0] sm:$0xff] }
  0x54   :  { %731 = vmatpush1.bf16.msra.mxu0 %v730_v23  ;;  %v409_v63 = vld [vmem:[#allocation7 + $0x20] sm:$0xff]  ;;  %v410_v0 = vld [vmem:[#allocation7 + $0x28] sm:$0xff]  ;;  %v808_v1 = vpack.c.bf16 %v458_v62, %v457_v60  ;;  %v428_v7 = vld [vmem:[#allocation7 + $0xb8] sm:$0xff] }
  0x55   :  { %763 = vmatpush1.bf16.msra.mxu1 %v762_v24  ;;  %733 = vmatprep.subr.bf16.mxu0 %v732_v25  ;;  %v778_v2 = vpack.c.bf16 %v410_v0, %v409_v63  ;;  %v441_v3 = vld [vmem:[#allocation7 + $0x120] sm:$0xff]  ;;  %v442_v4 = vld [vmem:[#allocation7 + $0x128] sm:$0xff]  ;;  %v459_v8 = vld [vmem:[#allocation7 + $0x1b0] sm:$0xff]  ;;  %v780_v9 = vpack.c.bf16 %v428_v7, %v427_v6 }
  0x56   :  { %765 = vmatprep.subr.bf16.mxu1 %v764_v28  ;;  %v810_v5 = vpack.c.bf16 %v442_v4, %v441_v3  ;;  %v460_v10 = vld [vmem:[#allocation7 + $0x1b8] sm:$0xff]  ;;  %v411_v11 = vld [vmem:[#allocation7 + $0x30] sm:$0xff]  ;;  %v429_v18 = vld [vmem:[#allocation7 + $0xc0] sm:$0xff] }
  0x57   :  { %v412_v12 = vld [vmem:[#allocation7 + $0x38] sm:$0xff]  ;;  %v812_v13 = vpack.c.bf16 %v460_v10, %v459_v8  ;;  %v443_v15 = vld [vmem:[#allocation7 + $0x130] sm:$0xff]  ;;  %v430_v19 = vld [vmem:[#allocation7 + $0xc8] sm:$0xff] }
  0x58   :  { %735 = vmatpush1.bf16.msra.mxu0 %v734_v31  ;;  %v782_v14 = vpack.c.bf16 %v412_v12, %v411_v11  ;;  %v444_v16 = vld [vmem:[#allocation7 + $0x138] sm:$0xff]  ;;  %v461_v20 = vld [vmem:[#allocation7 + $0x1c0] sm:$0xff]  ;;  %v784_v21 = vpack.c.bf16 %v430_v19, %v429_v18  ;;  %v462_v22 = vld [vmem:[#allocation7 + $0x1c8] sm:$0xff] }
  0x59   :  { %767 = vmatpush1.bf16.msra.mxu1 %v766_v32  ;;  %769 = vmatprep.subr.bf16.mxu0 %v768_v37  ;;  %v814_v17 = vpack.c.bf16 %v444_v16, %v443_v15  ;;  %v413_v23 = vld [vmem:[#allocation7 + $0x40] sm:$0xff]  ;;  %v414_v24 = vld [vmem:[#allocation7 + $0x48] sm:$0xff]  ;;  %v816_v25 = vpack.c.bf16 %v462_v22, %v461_v20  ;;  %v431_v30 = vld [vmem:[#allocation7 + $0xd0] sm:$0xff] }
  0x5a   :  { %801 = vmatprep.subr.bf16.mxu1 %v800_v41  ;;  %v786_v26 = vpack.c.bf16 %v414_v24, %v413_v23  ;;  %v445_v27 = vld [vmem:[#allocation7 + $0x140] sm:$0xff]  ;;  %v446_v28 = vld [vmem:[#allocation7 + $0x148] sm:$0xff]  ;;  %v432_v31 = vld [vmem:[#allocation7 + $0xd8] sm:$0xff] }
  0x5b   :  { %212 = vmatmul.mubr.f32.vlgmr.msra.gmra.mrb[0].mxu0 %v60_v33  ;;  %v818_v29 = vpack.c.bf16 %v446_v28, %v445_v27  ;;  %v463_v32 = vld [vmem:[#allocation7 + $0x1d0] sm:$0xff]  ;;  %v464_v34 = vld [vmem:[#allocation7 + $0x1d8] sm:$0xff]  ;;  %v434_v43 = vld [vmem:[#allocation7 + $0xe8] sm:$0xff] }
  0x5c   :  { %283 = vmatmul.mubr.f32.vlgmr.msra.gmra.mrb[0].mxu1 %v60_v33  ;;  %771 = vmatpush3.bf16.msra.mxu0 %v770_v42  ;;  %v788_v33 = vpack.c.bf16 %v432_v31, %v431_v30  ;;  %v415_v35 = vld [vmem:[#allocation7 + $0x50] sm:$0xff]  ;;  %v416_v36 = vld [vmem:[#allocation7 + $0x58] sm:$0xff]  ;;  %v820_v37 = vpack.c.bf16 %v464_v34, %v463_v32  ;;  %v433_v42 = vld [vmem:[#allocation7 + $0xe0] sm:$0xff] }
  0x5d   :  { %803 = vmatpush3.bf16.msra.mxu1 %v802_v45  ;;  %773 = vmatprep.subr.bf16.mxu0 %v772_v49  ;;  %v790_v38 = vpack.c.bf16 %v416_v36, %v415_v35  ;;  %v447_v39 = vld [vmem:[#allocation7 + $0x150] sm:$0xff]  ;;  %v448_v40 = vld [vmem:[#allocation7 + $0x158] sm:$0xff]  ;;  %v465_v44 = vld [vmem:[#allocation7 + $0x1e0] sm:$0xff]  ;;  %v792_v45 = vpack.c.bf16 %v434_v43, %v433_v42 }
  0x5e   :  { %805 = vmatprep.subr.bf16.mxu1 %v804_v53  ;;  %v822_v41 = vpack.c.bf16 %v448_v40, %v447_v39  ;;  %v466_v46 = vld [vmem:[#allocation7 + $0x1e8] sm:$0xff]  ;;  %v417_v47 = vld [vmem:[#allocation7 + $0x60] sm:$0xff]  ;;  %v436_v55 = vld [vmem:[#allocation7 + $0xf8] sm:$0xff] }
  0x5f   :  { %v418_v48 = vld [vmem:[#allocation7 + $0x68] sm:$0xff]  ;;  %v824_v49 = vpack.c.bf16 %v466_v46, %v465_v44  ;;  %v449_v51 = vld [vmem:[#allocation7 + $0x160] sm:$0xff]  ;;  %v467_v56 = vld [vmem:[#allocation7 + $0x1f0] sm:$0xff] }
  0x60   :  { %775 = vmatpush3.bf16.msra.mxu0 %v774_v54  ;;  %v794_v50 = vpack.c.bf16 %v418_v48, %v417_v47  ;;  %v450_v52 = vld [vmem:[#allocation7 + $0x168] sm:$0xff]  ;;  %v435_v54 = vld [vmem:[#allocation7 + $0xf0] sm:$0xff]  ;;  %v468_v58 = vld [vmem:[#allocation7 + $0x1f8] sm:$0xff] }
  0x61   :  { %807 = vmatpush3.bf16.msra.mxu1 %v806_v57  ;;  %777 = vmatprep.subr.bf16.mxu0 %v776_v61  ;;  %v826_v53 = vpack.c.bf16 %v450_v52, %v449_v51  ;;  %v796_v57 = vpack.c.bf16 %v436_v55, %v435_v54  ;;  %v419_v59 = vld [vmem:[#allocation7 + $0x70] sm:$0xff]  ;;  %v420_v60 = vld [vmem:[#allocation7 + $0x78] sm:$0xff]  ;;  %v828_v61 = vpack.c.bf16 %v468_v58, %v467_v56 }
  0x62   :  { %809 = vmatprep.subr.bf16.mxu1 %v808_v1  ;;  %v798_v62 = vpack.c.bf16 %v420_v60, %v419_v59  ;;  %v451_v63 = vld [vmem:[#allocation7 + $0x170] sm:$0xff]  ;;  %v452_v0 = vld [vmem:[#allocation7 + $0x178] sm:$0xff] }
  0x63   :  { %v830_v1 = vpack.c.bf16 %v452_v0, %v451_v63 }
  0x64   :  { %779 = vmatpush3.bf16.msra.mxu0 %v778_v2  ;;  %v127_v2 = vlaneseq }
  0x65   :  { %811 = vmatpush3.bf16.msra.mxu1 %v810_v5  ;;  %781 = vmatprep.subr.bf16.mxu0 %v780_v9  ;;  %v125_v5 = vld [vmem:[%s1078_s2] sm:$0xf] }
  0x66   :  { %813 = vmatprep.subr.bf16.mxu1 %v812_v13  ;;  %v128_v3 = vshrl.u32 %v127_v2, 7 }
  0x68   :  { %783 = vmatpush3.bf16.msra.mxu0 %v782_v14  ;;  %v129_v4 = vsub.s32 0, %v128_v3  ;;  %v137_v6 = vsub.s32 2, %v128_v3  ;;  %v133_v7 = vsub.s32 1, %v128_v3  ;;  %v141_v8 = vsub.s32 3, %v128_v3 }
  0x69   :  { %815 = vmatpush3.bf16.msra.mxu1 %v814_v17  ;;  %785 = vmatprep.subr.bf16.mxu0 %v784_v21 }
  0x6a   :  { %817 = vmatprep.subr.bf16.mxu1 %v816_v25  ;;  %v130_v9 = vrot.slane %v125_v5, %v129_v4  ;;  %v138_v10 = vrot.slane %v125_v5, %v137_v6  ;;  %v134_v11 = vrot.slane %v125_v5, %v133_v7  ;;  %v142_v12 = vrot.slane %v125_v5, %v141_v8 }
  0x6c   :  { %787 = vmatpush3.bf16.msra.mxu0 %v786_v26 }
  0x6d   :  { %819 = vmatpush3.bf16.msra.mxu1 %v818_v29  ;;  %789 = vmatprep.subr.bf16.mxu0 %v788_v33 }
  0x6e   :  { %821 = vmatprep.subr.bf16.mxu1 %v820_v37 }
  0x70   :  { %791 = vmatpush3.bf16.msra.mxu0 %v790_v38 }
  0x71   :  { %823 = vmatpush3.bf16.msra.mxu1 %v822_v41  ;;  %793 = vmatprep.subr.bf16.mxu0 %v792_v45 }
  0x72   :  { %825 = vmatprep.subr.bf16.mxu1 %v824_v49 }
  0x74   :  { %795 = vmatpush3.bf16.msra.mxu0 %v794_v50 }
  0x75   :  { %827 = vmatpush3.bf16.msra.mxu1 %v826_v53  ;;  %797 = vmatprep.subr.bf16.mxu0 %v796_v57 }
  0x76   :  { %829 = vmatprep.subr.bf16.mxu1 %v828_v61 }
  0x78   :  { %799 = vmatpush3.bf16.msra.mxu0 %v798_v62 }
  0x79   :  { %831 = vmatpush3.bf16.msra.mxu1 %v830_v1 }
 0x12e   :  { %v213_v13 = vpop.f32.mrb[0].mxu0 }
 0x12f   :  { %v1029_v14 = vadd.f32 %v213_v13, %v130_v9  ;;  %v284_v15 = vpop.f32.mrb[0].mxu1  ;;  %v215_v16 = vpop.f32.mrb[1].mxu0 }
 0x130   :  { %v1031_v17 = vadd.f32 %v284_v15, %v138_v10  ;;  %v1033_v18 = vadd.f32 %v215_v16, %v134_v11  ;;  %v286_v19 = vpop.f32.mrb[1].mxu1 }
 0x131   :  { %v1036_v20 = vmul.f32 0.70710677, %v1029_v14  ;;  %v1038_v21 = vadd.f32 %v286_v19, %v142_v12 }
 0x132   :  { %v1041_v22 = vmul.f32 0.70710677, %v1031_v17  ;;  %v1044_v23 = vmul.f32 0.70710677, %v1033_v18 }
 0x133   :  { %v297_v24 = vand.u32 2147483647, %v1036_v20  ;;  %v1048_v25 = vmul.f32 0.70710677, %v1038_v21  ;;  %vm385_vm0 = vcmp.lt.f32.partialorder %v1036_v20, 0.0  ;;  %v289_v20 = vmul.f32 0.5, %v1029_v14 }
 0x134   :  { %v299_v26 = vand.u32 2147483647, %v1041_v22  ;;  %v298_v27 = vand.u32 2147483647, %v1044_v23  ;;  %vm387_vm1 = vcmp.lt.f32.partialorder %v1041_v22, 0.0  ;;  %vm386_vm2 = vcmp.lt.f32.partialorder %v1044_v23, 0.0 }
 0x135   :  { %v301_v28 = vmul.f32 0.3275911, %v297_v24  ;;  %v300_v29 = vand.u32 2147483647, %v1048_v25  ;;  %v361_v40 = vmul.f32 %v297_v24, %v297_v24  ;;  %vm388_vm3 = vcmp.lt.f32.partialorder %v1048_v25, 0.0 }
 0x136   :  { %v303_v30 = vmul.f32 0.3275911, %v299_v26  ;;  %v302_v31 = vmul.f32 0.3275911, %v298_v27  ;;  %v363_v43 = vmul.f32 %v299_v26, %v299_v26  ;;  %v362_v51 = vmul.f32 %v298_v27, %v298_v27  ;;  %v633_v14 = vld [vmem:[%s1080_s4] ss:$0 sm:$0xff] }
 0x137   :  { %v305_v32 = vadd.f32 1.0, %v301_v28  ;;  %v304_v33 = vmul.f32 0.3275911, %v300_v29  ;;  %v365_v49 = vsub.f32 0.0, %v361_v40  ;;  %v364_v57 = vmul.f32 %v300_v29, %v300_v29 }
 0x138   :  { %v307_v34 = vadd.f32 1.0, %v303_v30  ;;  %v306_v35 = vadd.f32 1.0, %v302_v31  ;;  %v367_v53 = vsub.f32 0.0, %v363_v43  ;;  %v366_v63 = vsub.f32 0.0, %v362_v51 }
 0x139   :  { %841 = vrcp.f32 %v305_v32  ;;  %v308_v36 = vadd.f32 1.0, %v304_v33  ;;  %v369_v61 = vmul.f32 1.442695, %v365_v49  ;;  %v368_v5 = vsub.f32 0.0, %v364_v57 }
 0x13a   :  { %843 = vrcp.f32 %v307_v34  ;;  %v373_v1 = vmul.f32 1.442695, %v367_v53  ;;  %v371_v10 = vmul.f32 1.442695, %v366_v63 }
 0x13b   :  { %845 = vrcp.f32 %v306_v35  ;;  %v375_v16 = vmul.f32 1.442695, %v368_v5  ;;  %v292_v5 = vmul.f32 0.5, %v1038_v21 }
 0x13c   :  { %847 = vrcp.f32 %v308_v36 }
 0x13d   :  { %849 = vpow2.f32 %v369_v61 }
 0x13e   :  { %851 = vpow2.f32 %v373_v1  ;;  %v290_v1 = vmul.f32 0.5, %v1033_v18 }
 0x13f   :  { %853 = vpow2.f32 %v371_v10 }
 0x140   :  { %855 = vpow2.f32 %v375_v16 }
 0x143   :  { %v842_v37 = vpop.eup %841 }
 0x144   :  { %v844_v38 = vpop.eup %843  ;;  %v313_v39 = vmul.f32 %v842_v37, %v305_v32 }
 0x145   :  { %v315_v41 = vmul.f32 %v844_v38, %v307_v34  ;;  %v846_v44 = vpop.eup %845 }
 0x146   :  { %v317_v42 = vsub.f32 2.0, %v313_v39  ;;  %v314_v47 = vmul.f32 %v846_v44, %v306_v35  ;;  %v848_v48 = vpop.eup %847 }
 0x147   :  { %v319_v45 = vsub.f32 2.0, %v315_v41  ;;  %v316_v55 = vmul.f32 %v848_v48, %v308_v36  ;;  %v850_v39 = vpop.eup %849 }
 0x148   :  { %v321_v46 = vmul.f32 %v842_v37, %v317_v42  ;;  %v318_v54 = vsub.f32 2.0, %v314_v47  ;;  %v852_v41 = vpop.eup %851 }
 0x149   :  { %v323_v50 = vmul.f32 %v844_v38, %v319_v45  ;;  %v320_v60 = vsub.f32 2.0, %v316_v55  ;;  %v854_v51 = vpop.eup %853 }
 0x14a   :  { %v325_v52 = vmul.f32 1.0614054, %v321_v46  ;;  %v322_v59 = vmul.f32 %v846_v44, %v318_v54 }
 0x14b   :  { %v327_v56 = vmul.f32 1.0614054, %v323_v50  ;;  %v324_v2 = vmul.f32 %v848_v48, %v320_v60 }
 0x14c   :  { %v329_v58 = vadd.f32 -1.4531521, %v325_v52  ;;  %v326_v3 = vmul.f32 1.0614054, %v322_v59 }
 0x14d   :  { %v331_v62 = vadd.f32 -1.4531521, %v327_v56  ;;  %v328_v8 = vmul.f32 1.0614054, %v324_v2  ;;  %v856_v56 = vpop.eup %855 }
 0x14e   :  { %v333_v0 = vmul.f32 %v329_v58, %v321_v46  ;;  %v330_v7 = vadd.f32 -1.4531521, %v326_v3 }
 0x14f   :  { %v335_v4 = vmul.f32 %v331_v62, %v323_v50  ;;  %v332_v13 = vadd.f32 -1.4531521, %v328_v8  ;;  %v291_v8 = vmul.f32 0.5, %v1031_v17 }
 0x150   :  { %v337_v6 = vadd.f32 1.4214138, %v333_v0  ;;  %v334_v12 = vmul.f32 %v330_v7, %v322_v59 }
 0x151   :  { %v339_v9 = vadd.f32 1.4214138, %v335_v4  ;;  %v336_v26 = vmul.f32 %v332_v13, %v324_v2 }
 0x152   :  { %v341_v11 = vmul.f32 %v337_v6, %v321_v46  ;;  %v338_v24 = vadd.f32 1.4214138, %v334_v12 }
 0x153   :  { %v343_v15 = vmul.f32 %v339_v9, %v323_v50  ;;  %v340_v30 = vadd.f32 1.4214138, %v336_v26 }
 0x154   :  { %v345_v19 = vadd.f32 -0.28449672, %v341_v11  ;;  %v342_v29 = vmul.f32 %v338_v24, %v322_v59 }
 0x155   :  { %v347_v27 = vadd.f32 -0.28449672, %v343_v15  ;;  %v344_v34 = vmul.f32 %v340_v30, %v324_v2 }
 0x156   :  { %v349_v28 = vmul.f32 %v345_v19, %v321_v46  ;;  %v346_v33 = vadd.f32 -0.28449672, %v342_v29 }
 0x157   :  { %v351_v31 = vmul.f32 %v347_v27, %v323_v50  ;;  %v348_v38 = vadd.f32 -0.28449672, %v344_v34 }
 0x158   :  { %v353_v32 = vadd.f32 0.2548296, %v349_v28  ;;  %v350_v37 = vmul.f32 %v346_v33, %v322_v59 }
 0x159   :  { %v355_v35 = vadd.f32 0.2548296, %v351_v31  ;;  %v352_v44 = vmul.f32 %v348_v38, %v324_v2 }
 0x15a   :  { %v357_v36 = vmul.f32 %v353_v32, %v321_v46  ;;  %v354_v43 = vadd.f32 0.2548296, %v350_v37 }
 0x15b   :  { %v359_v40 = vmul.f32 %v355_v35, %v323_v50  ;;  %v356_v49 = vadd.f32 0.2548296, %v352_v44 }
 0x15c   :  { %v377_v42 = vmul.f32 %v850_v39, %v357_v36  ;;  %v358_v48 = vmul.f32 %v354_v43, %v322_v59 }
 0x15d   :  { %v379_v45 = vmul.f32 %v852_v41, %v359_v40  ;;  %v360_v55 = vmul.f32 %v356_v49, %v324_v2 }
 0x15e   :  { %v381_v47 = vsub.f32 1.0, %v377_v42  ;;  %v378_v54 = vmul.f32 %v854_v51, %v358_v48 }
 0x15f   :  { %v383_v52 = vsub.f32 1.0, %v379_v45  ;;  %v380_v58 = vmul.f32 %v856_v56, %v360_v55 }
 0x160   :  { %v389_v53 = vsub.f32 0.0, %v381_v47  ;;  %v382_v46 = vsub.f32 1.0, %v378_v54 }
 0x161   :  { %v391_v57 = vsub.f32 0.0, %v383_v52  ;;  %v384_v61 = vsub.f32 1.0, %v380_v58 }
 0x162   :  { %v393_v50 = vsel %vm385_vm0, %v389_v53, %v381_v47  ;;  %v390_v60 = vsub.f32 0.0, %v382_v46 }
 0x163   :  { %v395_v62 = vsel %vm387_vm1, %v391_v57, %v383_v52  ;;  %v397_v59 = vadd.f32 1.0, %v393_v50  ;;  %v392_v0 = vsub.f32 0.0, %v384_v61 }
 0x164   :  { %v394_v63 = vsel %vm386_vm2, %v390_v60, %v382_v46  ;;  %v399_v3 = vadd.f32 1.0, %v395_v62 }
 0x165   :  { %v398_v2 = vadd.f32 1.0, %v394_v63  ;;  %v396_v4 = vsel %vm388_vm3, %v392_v0, %v384_v61  ;;  %v401_v7 = vmul.f32 %v397_v59, %v289_v20 }
 0x166   :  { %v400_v6 = vadd.f32 1.0, %v396_v4  ;;  %v403_v9 = vmul.f32 %v399_v3, %v291_v8 }
 0x167   :  { %v402_v22 = vmul.f32 %v398_v2, %v290_v1 }
 0x168   :  { %v404_v23 = vmul.f32 %v400_v6, %v292_v5 }
 0x169   :  { %540 = vmatprep.mubr.f32.mxu0 %v402_v22 }
 0x16a   :  { %541 = vmatmul.mubr.f32.vlgmr.msra.gmra.mrb[2].mxu0 %v401_v7  ;;  %610 = vmatprep.mubr.f32.mxu1 %v404_v23 }
 0x16b   :  { %611 = vmatmul.mubr.f32.vlgmr.msra.gmra.mrb[2].mxu1 %v403_v9 }
 0x23d   :  { %v666_v18 = vpop.f32.mrb[2].mxu0 }
 0x23e   :  { %v667_v25 = vpop.f32.mrb[3].mxu0  ;;  %v701_v10 = vpop.f32.mrb[2].mxu1 }
 0x23f   :  { %v668_v11 = vadd.f32 %v667_v25, %v666_v18  ;;  %v702_v21 = vpop.f32.mrb[3].mxu1 }
 0x240   :  { %v703_v13 = vadd.f32 %v702_v21, %v701_v10 }
 0x241   :  { %v543_v12 = vadd.f32 %v668_v11, %v633_v14 }
 0x243   :  { %v613_v17 = vadd.f32 %v703_v13, %v543_v12 }
 0x245   :  { %616 = vst [vmem:[#allocation8] sm:$0xf] %v613_v17 }
 0x246   :  { %934 = shalt.err (!%p931_p0)
}
 0x247   :  { %s935_s12 = scalar_lea.hbm %s1081_s5, 64 }
 0x248   :  { %p936_p1 = scmp.ne.s32.totalorder %s1081_s5, %s935_s12  ;;  %p939_p2 = scmp.lt.u32.totalorder %s935_s12, %s1081_s5 }
 0x24a   :  { %p941_p3 = pnand %p939_p2, %p936_p1 }
 0x24c   :  { %944 = shalt.err (!%p941_p3)
}
 0x24d   :  { %626 = dma.vmem_to_hbm [thread:$0]  %s624_s9, 64, %s1081_s5, [#allocation4]  }
 0x24e   :  { %949 = dma.done.wait [#allocation4], 64  }
 0x24f   :  { %950 = vsyncadd [#allocation4], 4294967232 }
 0x250   :  { %630 = vsyncpa [#allocation3], 1 }
 0x251   :  { %631 = vsyncpa [#allocation6], 1 }
 0x252   :  { %632 = vsyncpa [#allocation4], 1 }

</bundles_post_ra>
